<compile_context>
chip_gen: v5e
topology: v5e:2x2
jax: 0.10.0
libtpu: 0.0.40
codegen_flags: <defaults>
</compile_context>

<pallas_src>
import jax
import jax.numpy as jnp
from jax.experimental import pallas as pl
from jax.experimental.pallas import tpu as pltpu

_MIB = 1 << 20


def _silu_kernel(x_ref, o_ref):
    # f32 in-register math: the kernel is HBM-bound, so the upcast is free and
    # accuracy is identical across input dtypes (v5e has no bf16 VPU/EUP path).
    x = x_ref[...].astype(jnp.float32)
    # sigmoid(x) = 0.5 * (tanh(x/2) + 1): exactly one EUP transcendental per
    # element (exp + divide would be two pushes on the single EUP unit).
    sig = 0.5 * (jnp.tanh(0.5 * x) + 1.0)
    o_ref[...] = (x * sig).astype(o_ref.dtype)


def _silu_ref(x):
    # Plain-JAX path for tiny tails; same formula as the kernel.
    xf = x.astype(jnp.float32)
    return (xf * (0.5 * (jnp.tanh(0.5 * xf) + 1.0))).astype(x.dtype)


def _chip_generation():
    """Best-effort TPU generation (7 / 6 / 5); defaults to 6 if unknown."""
    try:
        kind = jax.devices()[0].device_kind.lower()
    except Exception:
        return 6
    for g in (7, 6, 5, 4):
        if f"v{g}" in kind:
            return g
    return 6


def _target_block_bytes(gen):
    if gen >= 7:
        return 8 * _MIB   # 4 x 8 MiB (in+out, double-buffered) = 32 MiB
    if gen == 6:
        return 4 * _MIB   # 16 MiB double-buffered, well under 32 MiB scoped
    return 3 * _MIB       # v5e / unknown: conservative


def _sublane_pack(itemsize):
    # minimum second-to-last tile dim by dtype packing:
    # 8 (f32), 16 (bf16/f16), 32 (int8/fp8)
    return 8 * max(1, 4 // itemsize)


def _pick_lane_width(n, pack):
    """Largest lane width (multiple of 128) dividing n.

    Prefers widths that leave rows >= pack and rows % pack == 0 (full,
    unmasked last block); returns None if no candidate divides n.
    """
    best = None        # rows >= pack
    best_full = None   # rows >= pack and rows % pack == 0
    fallback = None    # divides at all
    for c in (8192, 6144, 4096, 3072, 2048, 1536, 1024, 768, 512, 384, 256, 128):
        if n % c:
            continue
        rows = n // c
        if fallback is None:
            fallback = c
        if rows >= pack:
            if best is None:
                best = c
            if best_full is None and rows % pack == 0:
                best_full = c
    if best_full is not None:
        return best_full
    if best is not None:
        return best
    return fallback


def _silu_2d(x2d, gen, pack):
    rows, lane_w = x2d.shape
    dtype = x2d.dtype
    itemsize = jnp.dtype(dtype).itemsize
    row_bytes = lane_w * itemsize
    target = _target_block_bytes(gen)

    # Row tile: ~target-sized blocks, multiple of the dtype's sublane pack,
    # or the full row extent for small inputs.
    tr = max(pack, (target // row_bytes) // pack * pack)
    if tr >= rows:
        tr = rows
        # Only v7x has 2 TensorCores: keep >= 2 parallel grid steps there.
        if gen >= 7 and rows >= 2 * pack:
            half = pl.cdiv(rows, 2)
            tr = max(pack, pl.cdiv(half, pack) * pack)

    grid = (pl.cdiv(rows, tr),)  # partial last block handled by Pallas

    # in + out blocks, double-buffered, plus headroom for compiler scratch.
    block_bytes = tr * lane_w * itemsize
    vmem_limit = max(32 * _MIB, 4 * block_bytes + 4 * _MIB)
    vmem_limit = min(vmem_limit, 64 * _MIB)

    return pl.pallas_call(
        _silu_kernel,
        out_shape=jax.ShapeDtypeStruct((rows, lane_w), dtype),
        grid_spec=pltpu.PrefetchScalarGridSpec(
            num_scalar_prefetch=0,
            grid=grid,
            in_specs=[pl.BlockSpec((tr, lane_w), lambda i: (i, 0))],
            out_specs=pl.BlockSpec((tr, lane_w), lambda i: (i, 0)),
        ),
        compiler_params=pltpu.CompilerParams(
            dimension_semantics=("parallel",),
            vmem_limit_bytes=int(vmem_limit),
        ),
    )(x2d)


def lambda_silu(x):
    """Lambda(fn) with fn(x) = x * sigmoid(x), applied elementwise via Pallas.

    x: any-shaped array (e.g. NCHW). Returns array of same shape/dtype.
    """
    orig_shape = x.shape
    dtype = x.dtype
    n = x.size
    if n == 0:
        return x
    itemsize = jnp.dtype(dtype).itemsize
    pack = _sublane_pack(itemsize)
    gen = _chip_generation()

    x_flat = jnp.ravel(x)
    lane_w = _pick_lane_width(n, pack)

    if lane_w is None:
        # Rare: element count has no multiple-of-128 factor.  Run the kernel on
        # the largest lane-divisible prefix and finish the (< lane_w) tail in
        # plain JAX — no full-tensor pad or slice passes through HBM.
        lane_w = 512 if n >= 512 * pack else 128
        main = (n // lane_w) * lane_w
        if main == 0:
            # tensor too tiny for a lane-dense tile; plain JAX is cheapest
            return _silu_ref(x_flat).reshape(orig_shape)
        head = _silu_2d(x_flat[:main].reshape(main // lane_w, lane_w), gen, pack)
        tail = _silu_ref(x_flat[main:])
        return jnp.concatenate([head.reshape(-1), tail]).reshape(orig_shape)

    rows = n // lane_w
    out2d = _silu_2d(x_flat.reshape(rows, lane_w), gen, pack)
    return out2d.reshape(orig_shape)


# TODO(synk): Lambda accepts an arbitrary Python callable; only the concrete
# elementwise fn chosen above is lowered to Pallas — a general fn cannot be.
# TODO(synk): int8/fp8 inputs would need an explicit scale/dequant path for a
# meaningful quantized SiLU; the cast-back here truncates for integer dtypes.


if __name__ == "__main__":
    key = jax.random.PRNGKey(0)
    # small NCHW input consistent with typical conv-net usage of Lambda
    x = jax.random.normal(key, (2, 4, 16, 16), dtype=jnp.float32)

    out = lambda_silu(x)
    jax.block_until_ready(out)

    # correctness check against plain-JAX reference of fn(x) = x * sigmoid(x)
    ref = x * jax.nn.sigmoid(x)
    assert out.shape == x.shape and out.dtype == x.dtype
    assert jnp.allclose(out, ref, atol=1e-5, rtol=1e-5)

    print("KERNEL_OK")
</pallas_src>

<mosaic_0001>
module attributes {stable_mosaic.version = 11 : i64} {
  func.func @_silu_kernel(%arg0: i32, %arg1: memref<8x256xf32, #tpu.memory_space<vmem>>, %arg2: memref<8x256xf32, #tpu.memory_space<vmem>>) attributes {dimension_semantics = [#tpu.dimension_semantics<parallel>], iteration_bounds = array<i64: 1>, scalar_prefetch = 0 : i64, scratch_operands = 0 : i64, tpu.core_type = #tpu.core_type<tc>, window_params = [{transform_indices = @transform_0, window_bounds = array<i64: 8, 256>}, {transform_indices = @transform_1, window_bounds = array<i64: 8, 256>}]} {
    %c0 = arith.constant 0 : index
    %c0_0 = arith.constant 0 : index
    %0 = vector.load %arg1[%c0, %c0_0] : memref<8x256xf32, #tpu.memory_space<vmem>>, vector<8x256xf32>
    %cst = arith.constant 5.000000e-01 : f32
    %1 = vector.broadcast %cst : f32 to vector<8x256xf32>
    %2 = arith.mulf %1, %0 : vector<8x256xf32>
    %3 = math.tanh %2 : vector<8x256xf32>
    %cst_1 = arith.constant 1.000000e+00 : f32
    %4 = vector.broadcast %cst_1 : f32 to vector<8x256xf32>
    %5 = arith.addf %3, %4 : vector<8x256xf32>
    %cst_2 = arith.constant 5.000000e-01 : f32
    %6 = vector.broadcast %cst_2 : f32 to vector<8x256xf32>
    %7 = arith.mulf %6, %5 : vector<8x256xf32>
    %8 = arith.mulf %0, %7 : vector<8x256xf32>
    %c0_3 = arith.constant 0 : index
    %c0_4 = arith.constant 0 : index
    %9 = vector.load %arg2[%c0_3, %c0_4] : memref<8x256xf32, #tpu.memory_space<vmem>>, vector<8x256xf32>
    tpu.vector_store %arg2[%c0_3, %c0_4], %8 {strides = array<i32>} : memref<8x256xf32, #tpu.memory_space<vmem>>, vector<8x256xf32>,
    return
  }
  func.func @transform_0(%arg0: i32) -> (i32, i32) {
    %c0_i32 = arith.constant 0 : i32
    %c0_i32_0 = arith.constant 0 : i32
    return %arg0, %c0_i32 : i32, i32
  }
  func.func @transform_1(%arg0: i32) -> (i32, i32) {
    %c0_i32 = arith.constant 0 : i32
    %c0_i32_0 = arith.constant 0 : i32
    return %arg0, %c0_i32 : i32, i32
  }
}

</mosaic_0001>

<bundles_post_ra>
// kernel: tpu_custom_call.1
= control target key start
LH: loop header
LB: loop body
LE: loop exit
PB: predicated region body
PF: predicated region fallthrough
CT: control target
= control target key end

     0   :  { %6 = vsyncpa [#allocation3], 0  ;;  %s130_s0 = inlined_call_operand.hbm [shape: f32[8,256], index: 0, kind: input, shape index: {}]   ;;  %s131_s1 = inlined_call_operand.hbm [shape: f32[8,256], index: 1, kind: output, shape index: {}]  }
   0x1   :  { %7 = vsyncpa [#allocation4], 0  ;;  %s13_s8 = sshll.u32 %s130_s0, 4  ;;  %s112_s9 = smov [#allocation2]   ;;  %s14_s8 = int_to_ptr.hbm [resolvable:$true] %s13_s8 }
   0x2   :  { %s15_s10 = sshll.u32 %s112_s9, 4  ;;  %s16_s10 = int_to_ptr.vmem [resolvable:$true] %s15_s10 }
   0x3   :  { %18 = dma.hbm_to_vmem [thread:$0]  %s14_s8, 256, %s16_s10, [#allocation3]  }
   0x4   :  { %108 = dma.done.wait [#allocation3], 256  }
   0x5   :  { %109 = vsyncadd [#allocation3], 4294967040  ;;  %v23_v0 = vld [vmem:[#allocation2] sm:$0xff]  ;;  %v24_v1 = vld [vmem:[#allocation2 + $0x8] sm:$0xff]  ;;  %s113_s11 = smov [#allocation5]   ;;  %s44_s14 = sshll.u32 %s131_s1, 4  ;;  %s45_s14 = int_to_ptr.hbm [resolvable:$true] %s44_s14 }
   0x6   :  { %v25_v2 = vmul.f32 0.5, %v23_v0  ;;  %v26_v3 = vmul.f32 0.5, %v24_v1  ;;  %s42_s0 = sshll.u32 %s113_s11, 4  ;;  %s43_s0 = int_to_ptr.vmem [resolvable:$true] %s42_s0 }
   0x8   :  { %56 = vtanh.f32 %v25_v2 }
   0x9   :  { %58 = vtanh.f32 %v26_v3 }
   0xe   :  { %v57_v4 = vpop.eup %56 }
   0xf   :  { %v59_v5 = vpop.eup %58  ;;  %v29_v6 = vadd.f32 1.0, %v57_v4 }
  0x10   :  { %v30_v7 = vadd.f32 1.0, %v59_v5 }
  0x11   :  { %v31_v8 = vmul.f32 0.5, %v29_v6 }
  0x12   :  { %v32_v9 = vmul.f32 0.5, %v30_v7 }
  0x13   :  { %v33_v10 = vmul.f32 %v31_v8, %v23_v0 }
  0x14   :  { %v34_v11 = vmul.f32 %v32_v9, %v24_v1 }
  0x15   :  { %35 = vst [vmem:[#allocation5] sm:$0xff] %v33_v10 }
  0x16   :  { %36 = vst [vmem:[#allocation5 + $0x8] sm:$0xff] %v34_v11 }
  0x17   :  { %47 = dma.vmem_to_hbm [thread:$0]  %s43_s0, 256, %s45_s14, [#allocation4]  }
  0x18   :  { %110 = dma.done.wait [#allocation4], 256  }
  0x19   :  { %111 = vsyncadd [#allocation4], 4294967040 }
  0x1a   :  { %52 = vsyncpa [#allocation3], 1 }
  0x1b   :  { %53 = vsyncpa [#allocation4], 1 }

</bundles_post_ra>
